<compile_context>
chip_gen: v5e
topology: v5e:2x2
jax: 0.10.0
libtpu: 0.0.40
codegen_flags: <defaults>
</compile_context>

<pallas_src>
import functools
import math

import jax
import jax.numpy as jnp
from jax.experimental import pallas as pl
from jax.experimental.pallas import tpu as pltpu


def _round_up(x, m):
    return ((x + m - 1) // m) * m


def _emb_kernel(ids_ref, table_ref, out_ref, acc_ref, *, scale):
    """One (token-block, vocab-chunk) grid step.

    ids_ref   : VMEM ref, (tb, 1) int32   -- token ids of this block
    table_ref : VMEM ref, (tv, d_pad)     -- this vocab chunk of the table
    out_ref   : VMEM ref, (tb, d_pad)     -- output tile (lane-dense)
    acc_ref   : VMEM scratch, (tb, d_pad) f32 accumulator (resident over v)
    """
    v = pl.program_id(1)
    tb, d_pad = out_ref.shape
    tv = table_ref.shape[0]

    @pl.when(v == 0)
    def _():
        acc_ref[...] = jnp.zeros_like(acc_ref)

    ids = ids_ref[...]                                            # (tb, 1) int32
    col = jax.lax.broadcasted_iota(jnp.int32, (tb, tv), 1) + v * tv
    # One-hot selection of this vocab chunk. Ids outside [0, vocab) match no
    # column anywhere -> zero row (safe, unlike an unchecked VMEM gather).
    onehot = jnp.where(ids == col, 1.0, 0.0).astype(table_ref.dtype)   # (tb, tv)

    acc_ref[...] += jnp.dot(
        onehot,
        table_ref[...],
        preferred_element_type=jnp.float32,
        precision=jax.lax.Precision.HIGHEST,
    )

    @pl.when(v == pl.num_programs(1) - 1)
    def _():
        out_ref[...] = (acc_ref[...] * scale).astype(out_ref.dtype)


def embeddings_forward(ids, table, *, tb=256, tv=2048):
    """Reproduces Embeddings.forward: table[ids] * sqrt(d_model)."""
    B, S = ids.shape
    vocab, d_model = table.shape
    n = B * S
    scale = float(math.sqrt(d_model))

    # Tile sizes (clamped for small inputs, kept (8,128)-friendly).
    tb = min(tb, _round_up(n, 8))
    tv = min(tv, _round_up(vocab, 128))

    # Padded problem sizes: token axis to a multiple of tb (ragged batches OK),
    # vocab to a multiple of tv, d_model to a multiple of 128 (lane-dense out).
    n_pad = _round_up(n, tb)
    v_pad = _round_up(vocab, tv)
    d_pad = _round_up(d_model, 128)

    ids_flat = ids.reshape(n).astype(jnp.int32)
    ids_p = jnp.pad(ids_flat, (0, n_pad - n)).reshape(n_pad, 1)
    table_p = jnp.pad(table, ((0, v_pad - vocab), (0, d_pad - d_model)))

    grid = (n_pad // tb, v_pad // tv)

    # VMEM budget: double-buffered ids/table/out tiles + f32 accumulator,
    # plus generous headroom for compiler scratch.
    vmem_bytes = 4 * (2 * tb + 2 * tv * d_pad + 2 * tb * d_pad + tb * d_pad)
    vmem_bytes = min(vmem_bytes + (16 << 20), 96 << 20)

    out_p = pl.pallas_call(
        functools.partial(_emb_kernel, scale=scale),
        out_shape=jax.ShapeDtypeStruct((n_pad, d_pad), table.dtype),
        grid=grid,
        in_specs=[
            pl.BlockSpec((tb, 1), lambda i, v: (i, 0)),        # ids block
            pl.BlockSpec((tv, d_pad), lambda i, v: (v, 0)),    # table chunk
        ],
        out_specs=pl.BlockSpec((tb, d_pad), lambda i, v: (i, 0)),
        scratch_shapes=[pltpu.VMEM((tb, d_pad), jnp.float32)],
        compiler_params=pltpu.CompilerParams(
            dimension_semantics=("parallel", "arbitrary"),
            vmem_limit_bytes=vmem_bytes,
        ),
    )(ids_p, table_p)

    return out_p[:n, :d_model].reshape(B, S, d_model)


if __name__ == "__main__":
    # Small, deterministic setup consistent with Embeddings(d_model, vocab).
    d_model = 32
    vocab = 50
    B, S = 2, 8

    key = jax.random.PRNGKey(0)
    k_tab, k_ids = jax.random.split(key)

    # nn.Embedding default init: N(0, 1) weights of shape (vocab, d_model).
    table = jax.random.normal(k_tab, (vocab, d_model), dtype=jnp.float32)
    ids = jax.random.randint(k_ids, (B, S), 0, vocab, dtype=jnp.int32)

    out = embeddings_forward(ids, table)
    out = jax.block_until_ready(out)

    # Pure-JAX reference check.
    ref = table[ids] * math.sqrt(d_model)
    assert out.shape == (B, S, d_model)
    assert jnp.allclose(out, ref, atol=1e-4, rtol=1e-4), float(
        jnp.max(jnp.abs(out - ref))
    )

    print("KERNEL_OK")
</pallas_src>

<mosaic_0001>
module attributes {stable_mosaic.version = 11 : i64} {
  func.func @_emb_kernel(%arg0: i32, %arg1: i32, %arg2: memref<16x1xi32, #tpu.memory_space<vmem>>, %arg3: memref<128x128xf32, #tpu.memory_space<vmem>>, %arg4: memref<16x128xf32, #tpu.memory_space<vmem>>, %arg5: memref<16x128xf32, #tpu.memory_space<vmem>>) attributes {dimension_semantics = [#tpu.dimension_semantics<parallel>, #tpu.dimension_semantics<arbitrary>], iteration_bounds = array<i64: 1, 1>, scalar_prefetch = 0 : i64, scratch_operands = 1 : i64, tpu.core_type = #tpu.core_type<tc>, window_params = [{transform_indices = @transform_0, window_bounds = array<i64: 16, 1>}, {transform_indices = @transform_1, window_bounds = array<i64: 128, 128>}, {transform_indices = @transform_2, window_bounds = array<i64: 16, 128>}]} {
    %c0_i32 = arith.constant 0 : i32
    %0 = arith.cmpi eq, %arg1, %c0_i32 : i32
    %1 = arith.extui %0 : i1 to i32
    %c0_i32_0 = arith.constant 0 : i32
    %2 = arith.cmpi ne, %1, %c0_i32_0 : i32
    scf.if %2 {
      %cst_12 = arith.constant 0.000000e+00 : f32
      %21 = vector.broadcast %cst_12 : f32 to vector<16x128xf32>
      %c0_13 = arith.constant 0 : index
      %c0_14 = arith.constant 0 : index
      %22 = vector.load %arg5[%c0_13, %c0_14] : memref<16x128xf32, #tpu.memory_space<vmem>>, vector<16x128xf32>
      tpu.vector_store %arg5[%c0_13, %c0_14], %21 {strides = array<i32>} : memref<16x128xf32, #tpu.memory_space<vmem>>, vector<16x128xf32>,
    } else {
    }
    %c0 = arith.constant 0 : index
    %c0_1 = arith.constant 0 : index
    %3 = vector.load %arg2[%c0, %c0_1] : memref<16x1xi32, #tpu.memory_space<vmem>>, vector<16x1xi32>
    %4 = tpu.iota {dimensions = array<i32: 1>} : vector<16x128xi32>
    %c128_i32 = arith.constant 128 : i32
    %5 = arith.muli %arg1, %c128_i32 : i32
    %6 = vector.broadcast %5 : i32 to vector<16x128xi32>
    %7 = arith.addi %4, %6 : vector<16x128xi32>
    %8 = vector.broadcast %3 : vector<16x1xi32> to vector<16x128xi32>
    %9 = arith.cmpi eq, %8, %7 : vector<16x128xi32>
    %cst = arith.constant 1.000000e+00 : f32
    %cst_2 = arith.constant 0.000000e+00 : f32
    %10 = vector.broadcast %cst : f32 to vector<16x128xf32>
    %11 = vector.broadcast %cst_2 : f32 to vector<16x128xf32>
    %12 = arith.select %9, %10, %11 : vector<16x128xi1>, vector<16x128xf32>
    %c0_3 = arith.constant 0 : index
    %c0_4 = arith.constant 0 : index
    %13 = vector.load %arg5[%c0_3, %c0_4] : memref<16x128xf32, #tpu.memory_space<vmem>>, vector<16x128xf32>
    %c0_5 = arith.constant 0 : index
    %c0_6 = arith.constant 0 : index
    %14 = vector.load %arg3[%c0_5, %c0_6] : memref<128x128xf32, #tpu.memory_space<vmem>>, vector<128x128xf32>
    %cst_7 = arith.constant dense<0.000000e+00> : vector<16x128xf32>
    %15 = tpu.matmul %12, %14, %cst_7 {dimension_numbers = #tpu.dot_dimension_numbers<[1], [0], [0], [1], [0, 0, 1, 1], [], []>, precision = #tpu.contract_precision<fp32>} : vector<16x128xf32>, vector<128x128xf32>, vector<16x128xf32> -> vector<16x128xf32>
    %16 = arith.addf %13, %15 : vector<16x128xf32>
    %c0_8 = arith.constant 0 : index
    %c0_9 = arith.constant 0 : index
    %17 = vector.load %arg5[%c0_8, %c0_9] : memref<16x128xf32, #tpu.memory_space<vmem>>, vector<16x128xf32>
    tpu.vector_store %arg5[%c0_8, %c0_9], %16 {strides = array<i32>} : memref<16x128xf32, #tpu.memory_space<vmem>>, vector<16x128xf32>,
    %c0_i32_10 = arith.constant 0 : i32
    %18 = arith.cmpi eq, %arg1, %c0_i32_10 : i32
    %19 = arith.extui %18 : i1 to i32
    %c0_i32_11 = arith.constant 0 : i32
    %20 = arith.cmpi ne, %19, %c0_i32_11 : i32
    scf.if %20 {
      %c0_12 = arith.constant 0 : index
      %c0_13 = arith.constant 0 : index
      %21 = vector.load %arg5[%c0_12, %c0_13] : memref<16x128xf32, #tpu.memory_space<vmem>>, vector<16x128xf32>
      %cst_14 = arith.constant 5.65685415 : f32
      %22 = vector.broadcast %cst_14 : f32 to vector<16x128xf32>
      %23 = arith.mulf %21, %22 : vector<16x128xf32>
      %c0_15 = arith.constant 0 : index
      %c0_16 = arith.constant 0 : index
      %24 = vector.load %arg4[%c0_15, %c0_16] : memref<16x128xf32, #tpu.memory_space<vmem>>, vector<16x128xf32>
      tpu.vector_store %arg4[%c0_15, %c0_16], %23 {strides = array<i32>} : memref<16x128xf32, #tpu.memory_space<vmem>>, vector<16x128xf32>,
    } else {
    }
    return
  }
  func.func @transform_0(%arg0: i32, %arg1: i32) -> (i32, i32) {
    %c0_i32 = arith.constant 0 : i32
    %c0_i32_0 = arith.constant 0 : i32
    return %arg0, %c0_i32 : i32, i32
  }
  func.func @transform_1(%arg0: i32, %arg1: i32) -> (i32, i32) {
    %c0_i32 = arith.constant 0 : i32
    %c0_i32_0 = arith.constant 0 : i32
    return %arg1, %c0_i32 : i32, i32
  }
  func.func @transform_2(%arg0: i32, %arg1: i32) -> (i32, i32) {
    %c0_i32 = arith.constant 0 : i32
    %c0_i32_0 = arith.constant 0 : i32
    return %arg0, %c0_i32 : i32, i32
  }
}

</mosaic_0001>

<bundles_post_ra>
// kernel: tpu_custom_call.1
= control target key start
LH: loop header
LB: loop body
LE: loop exit
PB: predicated region body
PF: predicated region fallthrough
CT: control target
= control target key end

     0   :  { %7 = vsyncpa [#allocation4], 0  ;;  %s795_s0 = inlined_call_operand.vmem [shape: s32[16,1], index: 0, kind: input, shape index: {}]   ;;  %s796_s1 = inlined_call_operand.hbm [shape: f32[128,128], index: 1, kind: input, shape index: {}]   ;;  %s797_s2 = inlined_call_operand.hbm [shape: f32[16,128], index: 2, kind: output, shape index: {}]  }
   0x1   :  { %8 = vsyncpa [#allocation5], 0  ;;  %s15_s11 = sshll.u32 %s796_s1, 4  ;;  %s559_s12 = smov [#allocation3]   ;;  %s16_s11 = int_to_ptr.hbm [resolvable:$true] %s15_s11 }
   0x2   :  { %s17_s13 = sshll.u32 %s559_s12, 4  ;;  %s560_s14 = smov 128   ;;  %s18_s13 = int_to_ptr.vmem [resolvable:$true] %s17_s13 }
   0x3   :  { %s561_s15 = smov 8  }
   0x4   :  { %23 = dma.hbm_to_vmem [thread:$0]  %s16_s11, 2048, %s18_s13, [#allocation4], %s560_s14, %s560_s14, %s561_s15  }
   0x5   :  { %555 = dma.done.wait [#allocation4], 2048  }
   0x6   :  { %556 = vsyncadd [#allocation4], 4294965248  ;;  %v562_v0 = vmov 0   ;;  %v34_v1 = vld [vmem:[%s795_s0] sm:$0xff]  ;;  %v68_v2 = vld [vmem:[#allocation3 + $0x78] sm:$0xff]  ;;  %s448_s22 = sshll.u32 %s797_s2, 4  ;;  %s449_s22 = int_to_ptr.hbm [resolvable:$true] %s448_s22 }
   0x7   :  { %506 = vset.pattern.permute.xlu0 %v562_v0  ;;  %v590_v3 = vand.u32 4294901760, %v68_v2  ;;  %v67_v4 = vld [vmem:[#allocation3 + $0x70] sm:$0xff]  ;;  %v66_v5 = vld [vmem:[#allocation3 + $0x68] sm:$0xff]  ;;  %v65_v6 = vld [vmem:[#allocation3 + $0x60] sm:$0xff] }
   0x8   :  { %42 = vperm.xlu0 %506, %v34_v1   ;;  %v592_v7 = vand.u32 4294901760, %v67_v4  ;;  %v594_v8 = vand.u32 4294901760, %v66_v5  ;;  %v596_v9 = vand.u32 4294901760, %v65_v6  ;;  %v64_v10 = vld [vmem:[#allocation3 + $0x58] sm:$0xff]  ;;  %v63_v11 = vld [vmem:[#allocation3 + $0x50] sm:$0xff]  ;;  %v62_v12 = vld [vmem:[#allocation3 + $0x48] sm:$0xff] }
   0x9   :  { %v117_v13 = vsub.f32 %v68_v2, %v590_v3  ;;  %277 = vmatpush.msra.mxu3 %v590_v3  ;;  %v600_v14 = vand.u32 4294901760, %v64_v10  ;;  %70 = vmatpush.msra.mxu0 %v590_v3  ;;  %v603_v15 = vand.u32 4294901760, %v63_v11  ;;  %v605_v16 = vand.u32 4294901760, %v62_v12  ;;  %v61_v17 = vld [vmem:[#allocation3 + $0x40] sm:$0xff]  ;;  %v35_v25 = vld [vmem:[%s795_s0 + $0x8] sm:$0xff]  ;;  %v60_v35 = vld [vmem:[#allocation3 + $0x38] sm:$0xff] }
   0xa   :  { %v123_v18 = vsub.f32 %v67_v4, %v592_v7  ;;  %v129_v19 = vsub.f32 %v66_v5, %v594_v8  ;;  %v135_v20 = vsub.f32 %v65_v6, %v596_v9  ;;  %v610_v21 = vand.u32 4294901760, %v61_v17  ;;  %v59_v39 = vld [vmem:[#allocation3 + $0x30] sm:$0xff]  ;;  %v58_v40 = vld [vmem:[#allocation3 + $0x28] sm:$0xff]  ;;  %v57_v43 = vld [vmem:[#allocation3 + $0x20] sm:$0xff]  ;;  %s565_s0 = smov [#allocation6]  }
   0xb   :  { %v612_v22 = vand.u32 4294901760, %v117_v13  ;;  %221 = vmatpush.msra.mxu2 %v117_v13  ;;  %279 = vmatpush.msra.mxu3 %v592_v7  ;;  %v141_v23 = vsub.f32 %v64_v10, %v600_v14  ;;  %v147_v24 = vsub.f32 %v63_v11, %v603_v15  ;;  %v153_v29 = vsub.f32 %v62_v12, %v605_v16  ;;  %v56_v50 = vld [vmem:[#allocation3 + $0x18] sm:$0xff]  ;;  %v55_v57 = vld [vmem:[#allocation3 + $0x10] sm:$0xff]  ;;  %v54_v63 = vld [vmem:[#allocation3 + $0x8] sm:$0xff]  ;;  %s446_s19 = sshll.u32 %s565_s0, 4  ;;  %s447_s19 = int_to_ptr.vmem [resolvable:$true] %s446_s19 }
   0xc   :  { %v620_v26 = vand.u32 4294901760, %v123_v18  ;;  %v622_v27 = vand.u32 4294901760, %v129_v19  ;;  %v624_v28 = vand.u32 4294901760, %v135_v20  ;;  %72 = vmatpush.msra.mxu0 %v592_v7  ;;  %v159_v34 = vsub.f32 %v61_v17, %v610_v21  ;;  %v53_v6 = vld [vmem:[#allocation3] sm:$0xff] }
   0xd   :  { %v119_v30 = vsub.f32 %v117_v13, %v612_v22  ;;  %224 = vmatpush.msra.mxu2 %v123_v18  ;;  %v629_v31 = vand.u32 4294901760, %v141_v23  ;;  %281 = vmatpush.msra.mxu3 %v594_v8  ;;  %v637_v38 = vand.u32 4294901760, %v147_v24  ;;  %v640_v42 = vand.u32 4294901760, %v153_v29 }
   0xe   :  { %v125_v32 = vsub.f32 %v123_v18, %v620_v26  ;;  %v131_v33 = vsub.f32 %v129_v19, %v622_v27  ;;  %74 = vmatpush.msra.mxu0 %v594_v8  ;;  %v137_v37 = vsub.f32 %v135_v20, %v624_v28  ;;  %v644_v46 = vand.u32 4294901760, %v60_v35 }
   0xf   :  { %v120_v36 = vand.u32 4294901760, %v119_v30  ;;  %227 = vmatpush.msra.mxu2 %v129_v19  ;;  %283 = vmatpush.msra.mxu3 %v596_v9  ;;  %v143_v45 = vsub.f32 %v141_v23, %v629_v31  ;;  %v647_v47 = vand.u32 4294901760, %v159_v34  ;;  %v650_v48 = vand.u32 4294901760, %v59_v39 }
  0x10   :  { %45 = vperm.xlu0 %506, %v35_v25   ;;  %v126_v41 = vand.u32 4294901760, %v125_v32  ;;  %76 = vmatpush.msra.mxu0 %v596_v9  ;;  %v132_v44 = vand.u32 4294901760, %v131_v33  ;;  %v652_v49 = vand.u32 4294901760, %v58_v40  ;;  %v138_v51 = vand.u32 4294901760, %v137_v37 }
  0x11   :  { %121 = vmatpush.msra.mxu1 %v120_v36  ;;  %230 = vmatpush.msra.mxu2 %v135_v20  ;;  %v149_v52 = vsub.f32 %v147_v24, %v637_v38  ;;  %v165_v53 = vsub.f32 %v60_v35, %v644_v46  ;;  %v656_v54 = vand.u32 4294901760, %v57_v43  ;;  %v155_v55 = vsub.f32 %v153_v29, %v640_v42 }
  0x12   :  { %285 = vmatpush.msra.mxu3 %v600_v14  ;;  %78 = vmatpush.msra.mxu0 %v600_v14  ;;  %v171_v56 = vsub.f32 %v59_v39, %v650_v48  ;;  %v144_v58 = vand.u32 4294901760, %v143_v45  ;;  %v177_v60 = vsub.f32 %v58_v40, %v652_v49  ;;  %v665_v61 = vand.u32 4294901760, %v56_v50 }
  0x13   :  { %127 = vmatpush.msra.mxu1 %v126_v41  ;;  %233 = vmatpush.msra.mxu2 %v141_v23  ;;  %v662_v59 = vand.u32 4294901760, %v165_v53  ;;  %v161_v62 = vsub.f32 %v159_v34, %v647_v47  ;;  %v150_v0 = vand.u32 4294901760, %v149_v52  ;;  %v183_v2 = vsub.f32 %v57_v43, %v656_v54 }
  0x14   :  { %287 = vmatpush.msra.mxu3 %v603_v15  ;;  %80 = vmatpush.msra.mxu0 %v603_v15  ;;  %v670_v1 = vand.u32 4294901760, %v171_v56  ;;  %v673_v4 = vand.u32 4294901760, %v55_v57  ;;  %v156_v5 = vand.u32 4294901760, %v155_v55  ;;  %v678_v11 = vand.u32 4294901760, %v177_v60 }
  0x15   :  { %133 = vmatpush.msra.mxu1 %v132_v44  ;;  %236 = vmatpush.msra.mxu2 %v147_v24  ;;  %v167_v10 = vsub.f32 %v165_v53, %v662_v59  ;;  %v189_v12 = vsub.f32 %v56_v50, %v665_v61  ;;  %v681_v13 = vand.u32 4294901760, %v54_v63  ;;  %v162_v17 = vand.u32 4294901760, %v161_v62 }
  0x16   :  { %289 = vmatpush.msra.mxu3 %v605_v16  ;;  %82 = vmatpush.msra.mxu0 %v605_v16  ;;  %v173_v18 = vsub.f32 %v171_v56, %v670_v1  ;;  %v686_v19 = vand.u32 4294901760, %v183_v2  ;;  %v195_v20 = vsub.f32 %v55_v57, %v673_v4  ;;  %v689_v23 = vand.u32 4294901760, %v53_v6 }
  0x17   :  { %139 = vmatpush.msra.mxu1 %v138_v51  ;;  %239 = vmatpush.msra.mxu2 %v153_v29  ;;  %v168_v24 = vand.u32 4294901760, %v167_v10  ;;  %v179_v25 = vsub.f32 %v177_v60, %v678_v11  ;;  %v694_v29 = vand.u32 4294901760, %v189_v12  ;;  %v201_v30 = vsub.f32 %v54_v63, %v681_v13 }
  0x18   :  { %291 = vmatpush.msra.mxu3 %v610_v21  ;;  %84 = vmatpush.msra.mxu0 %v610_v21  ;;  %v174_v32 = vand.u32 4294901760, %v173_v18  ;;  %v185_v33 = vsub.f32 %v183_v2, %v686_v19  ;;  %v207_v35 = vsub.f32 %v53_v6, %v689_v23 }
  0x19   :  { %145 = vmatpush.msra.mxu1 %v144_v58  ;;  %242 = vmatpush.msra.mxu2 %v159_v34  ;;  %v700_v34 = vand.u32 4294901760, %v195_v20  ;;  %v180_v36 = vand.u32 4294901760, %v179_v25  ;;  %v191_v37 = vsub.f32 %v189_v12, %v694_v29  ;;  %v706_v39 = vand.u32 4294901760, %v201_v30 }
  0x1a   :  { %293 = vmatpush.msra.mxu3 %v644_v46  ;;  %86 = vmatpush.msra.mxu0 %v644_v46  ;;  %v186_v40 = vand.u32 4294901760, %v185_v33  ;;  %v711_v43 = vand.u32 4294901760, %v207_v35 }
  0x1b   :  { %151 = vmatpush.msra.mxu1 %v150_v0  ;;  %245 = vmatpush.msra.mxu2 %v165_v53  ;;  %v197_v41 = vsub.f32 %v195_v20, %v700_v34  ;;  %v192_v44 = vand.u32 4294901760, %v191_v37  ;;  %v203_v45 = vsub.f32 %v201_v30, %v706_v39 }
  0x1c   :  { %295 = vmatpush.msra.mxu3 %v650_v48  ;;  %88 = vmatpush.msra.mxu0 %v650_v48  ;;  %v209_v51 = vsub.f32 %v207_v35, %v711_v43 }
  0x1d   :  { %157 = vmatpush.msra.mxu1 %v156_v5  ;;  %248 = vmatpush.msra.mxu2 %v171_v56  ;;  %v198_v50 = vand.u32 4294901760, %v197_v41  ;;  %v204_v52 = vand.u32 4294901760, %v203_v45 }
  0x1e   :  { %297 = vmatpush.msra.mxu3 %v652_v49  ;;  %90 = vmatpush.msra.mxu0 %v652_v49  ;;  %v210_v53 = vand.u32 4294901760, %v209_v51 }
  0x1f   :  { %163 = vmatpush.msra.mxu1 %v162_v17  ;;  %251 = vmatpush.msra.mxu2 %v177_v60 }
  0x20   :  { %299 = vmatpush.msra.mxu3 %v656_v54  ;;  %92 = vmatpush.msra.mxu0 %v656_v54 }
  0x21   :  { %169 = vmatpush.msra.mxu1 %v168_v24  ;;  %254 = vmatpush.msra.mxu2 %v183_v2 }
  0x22   :  { %301 = vmatpush.msra.mxu3 %v665_v61  ;;  %94 = vmatpush.msra.mxu0 %v665_v61 }
  0x23   :  { %175 = vmatpush.msra.mxu1 %v174_v32  ;;  %257 = vmatpush.msra.mxu2 %v189_v12 }
  0x24   :  { %303 = vmatpush.msra.mxu3 %v673_v4  ;;  %96 = vmatpush.msra.mxu0 %v673_v4 }
  0x25   :  { %181 = vmatpush.msra.mxu1 %v180_v36  ;;  %260 = vmatpush.msra.mxu2 %v195_v20 }
  0x26   :  { %305 = vmatpush.msra.mxu3 %v681_v13  ;;  %98 = vmatpush.msra.mxu0 %v681_v13 }
  0x27   :  { %187 = vmatpush.msra.mxu1 %v186_v40  ;;  %263 = vmatpush.msra.mxu2 %v201_v30 }
  0x28   :  { %307 = vmatpush.msra.mxu3 %v689_v23  ;;  %100 = vmatpush.msra.mxu0 %v689_v23 }
  0x29   :  { %193 = vmatpush.msra.mxu1 %v192_v44  ;;  %266 = vmatpush.msra.mxu2 %v207_v35 }
  0x2a   :  { %483 = vmatpush.msrb.mxu3 %v590_v3  ;;  %322 = vmatpush.msrb.mxu0 %v612_v22 }
  0x2b   :  { %467 = vmatpush.msrb.mxu2 %v612_v22  ;;  %199 = vmatpush.msra.mxu1 %v198_v50 }
  0x2c   :  { %484 = vmatpush.msrb.mxu3 %v592_v7  ;;  %326 = vmatpush.msrb.mxu0 %v620_v26 }
  0x2d   :  { %468 = vmatpush.msrb.mxu2 %v620_v26  ;;  %205 = vmatpush.msra.mxu1 %v204_v52 }
  0x2e   :  { %485 = vmatpush.msrb.mxu3 %v594_v8  ;;  %330 = vmatpush.msrb.mxu0 %v622_v27 }
  0x2f   :  { %469 = vmatpush.msrb.mxu2 %v622_v27  ;;  %211 = vmatpush.msra.mxu1 %v210_v53 }
  0x30   :  { %486 = vmatpush.msrb.mxu3 %v596_v9  ;;  %334 = vmatpush.msrb.mxu0 %v624_v28 }
  0x31   :  { %391 = vmatpush.msrb.mxu1 %v590_v3  ;;  %470 = vmatpush.msrb.mxu2 %v624_v28  ;;  %v36_v3 = vlaneseq }
  0x32   :  { %487 = vmatpush.msrb.mxu3 %v600_v14  ;;  %338 = vmatpush.msrb.mxu0 %v629_v31 }
  0x33   :  { %393 = vmatpush.msrb.mxu1 %v592_v7  ;;  %471 = vmatpush.msrb.mxu2 %v629_v31  ;;  %v37_v7 = vand.u32 127, %v36_v3 }
  0x34   :  { %488 = vmatpush.msrb.mxu3 %v603_v15  ;;  %342 = vmatpush.msrb.mxu0 %v637_v38 }
  0x35   :  { %395 = vmatpush.msrb.mxu1 %v594_v8  ;;  %472 = vmatpush.msrb.mxu2 %v637_v38 }
  0x36   :  { %489 = vmatpush.msrb.mxu3 %v605_v16  ;;  %346 = vmatpush.msrb.mxu0 %v640_v42 }
  0x37   :  { %397 = vmatpush.msrb.mxu1 %v596_v9  ;;  %473 = vmatpush.msrb.mxu2 %v640_v42  ;;  %v563_v9 = vmov 1.0  }
  0x38   :  { %490 = vmatpush.msrb.mxu3 %v610_v21  ;;  %350 = vmatpush.msrb.mxu0 %v647_v47 }
  0x39   :  { %399 = vmatpush.msrb.mxu1 %v600_v14  ;;  %474 = vmatpush.msrb.mxu2 %v647_v47  ;;  %v564_v14 = vmov 0.0  }
  0x3a   :  { %491 = vmatpush.msrb.mxu3 %v644_v46  ;;  %354 = vmatpush.msrb.mxu0 %v662_v59 }
  0x3b   :  { %401 = vmatpush.msrb.mxu1 %v603_v15  ;;  %475 = vmatpush.msrb.mxu2 %v662_v59 }
  0x3c   :  { %492 = vmatpush.msrb.mxu3 %v650_v48  ;;  %358 = vmatpush.msrb.mxu0 %v670_v1 }
  0x3d   :  { %403 = vmatpush.msrb.mxu1 %v605_v16  ;;  %476 = vmatpush.msrb.mxu2 %v670_v1 }
  0x3e   :  { %493 = vmatpush.msrb.mxu3 %v652_v49  ;;  %362 = vmatpush.msrb.mxu0 %v678_v11 }
  0x3f   :  { %405 = vmatpush.msrb.mxu1 %v610_v21  ;;  %477 = vmatpush.msrb.mxu2 %v678_v11 }
  0x40   :  { %494 = vmatpush.msrb.mxu3 %v656_v54  ;;  %366 = vmatpush.msrb.mxu0 %v686_v19 }
  0x41   :  { %407 = vmatpush.msrb.mxu1 %v644_v46  ;;  %478 = vmatpush.msrb.mxu2 %v686_v19 }
  0x42   :  { %495 = vmatpush.msrb.mxu3 %v665_v61  ;;  %370 = vmatpush.msrb.mxu0 %v694_v29 }
  0x43   :  { %409 = vmatpush.msrb.mxu1 %v650_v48  ;;  %479 = vmatpush.msrb.mxu2 %v694_v29 }
  0x44   :  { %496 = vmatpush.msrb.mxu3 %v673_v4  ;;  %374 = vmatpush.msrb.mxu0 %v700_v34 }
  0x45   :  { %411 = vmatpush.msrb.mxu1 %v652_v49  ;;  %480 = vmatpush.msrb.mxu2 %v700_v34 }
  0x46   :  { %497 = vmatpush.msrb.mxu3 %v681_v13  ;;  %378 = vmatpush.msrb.mxu0 %v706_v39 }
  0x47   :  { %413 = vmatpush.msrb.mxu1 %v656_v54  ;;  %481 = vmatpush.msrb.mxu2 %v706_v39 }
  0x48   :  { %498 = vmatpush.msrb.mxu3 %v689_v23  ;;  %382 = vmatpush.msrb.mxu0 %v711_v43 }
  0x49   :  { %415 = vmatpush.msrb.mxu1 %v665_v61  ;;  %482 = vmatpush.msrb.mxu2 %v711_v43 }
  0x4b   :  { %417 = vmatpush.msrb.mxu1 %v673_v4 }
  0x4d   :  { %419 = vmatpush.msrb.mxu1 %v681_v13 }
  0x4f   :  { %421 = vmatpush.msrb.mxu1 %v689_v23 }
  0x7a   :  { %v43_v8 = vpop.permute.xlu0 %42 }
  0x7b   :  { %vm47_vm0 = vcmp.eq.s32.totalorder %v43_v8, %v37_v7 }
  0x7c   :  { %461 = vmatmul.msk.f32.vlgmr.msra.gmra.mxu1 %vm47_vm0, %v563_v9  ;;  %v49_v15 = vsel %vm47_vm0, 1.0, %v564_v14 }
  0x7d   :  { %v101_v16 = vsub.f32 %v49_v15, %v49_v15 }
  0x7f   :  { %268 = vmatmul.f32.vlgmr.msra.gmra.mxu2 %v101_v16  ;;  %v102_v21 = vand.u32 4294901760, %v101_v16 }
  0x81   :  { %310 = vmatmul.f32.vlgmr.msra.gmra.mxu3 %v102_v21  ;;  %v103_v22 = vsub.f32 %v101_v16, %v102_v21 }
  0x82   :  { %v46_v26 = vpop.permute.xlu0 %45 }
  0x83   :  { %vm48_vm1 = vcmp.eq.s32.totalorder %v46_v26, %v37_v7  ;;  %v104_v27 = vand.u32 4294901760, %v103_v22 }
  0x84   :  { %462 = vmatmul.msk.f32.gmra.mxu1 %vm48_vm1, %v563_v9  ;;  %v50_v28 = vsel %vm48_vm1, 1.0, %v564_v14 }
  0x85   :  { %105 = vmatmul.f32.vlgmr.msra.gmra.mxu0 %v104_v27  ;;  %v108_v31 = vsub.f32 %v50_v28, %v50_v28 }
  0x87   :  { %272 = vmatmul.f32.gmra.mxu2 %v108_v31  ;;  %v109_v38 = vand.u32 4294901760, %v108_v31 }
  0x89   :  { %315 = vmatmul.f32.gmra.mxu3 %v109_v38  ;;  %v110_v42 = vsub.f32 %v108_v31, %v109_v38 }
  0x8b   :  { %v111_v46 = vand.u32 4294901760, %v110_v42 }
  0x8c   :  { %465 = vmatmul.msk.f32.vlgmr.msrb.gmra.mxu1 %vm47_vm0, %v563_v9 }
  0x8d   :  { %112 = vmatmul.f32.gmra.mxu0 %v111_v46 }
  0x8f   :  { %464 = vmatmul.msk.f32.vlgmr.msrb.gmra.mxu2 %vm48_vm1, %v563_v9 }
  0x91   :  { %466 = vmatmul.msk.f32.vlgmr.msrb.gmra.mxu3 %vm48_vm1, %v563_v9 }
  0x95   :  { %463 = vmatmul.msk.f32.vlgmr.msrb.gmra.mxu0 %vm47_vm0, %v563_v9 }
  0xf9   :  { %v213_v47 = vpop.f32.mrf.mxu1 }
 0x101   :  { %v216_v55 = vpop.f32.mrf.mxu1 }
 0x102   :  { %v106_v48 = vpop.f32.mrf.mxu0  ;;  %v269_v49 = vpop.f32.mrf.mxu2 }
 0x103   :  { %v214_v56 = vadd.f32 %v213_v47, %v106_v48 }
 0x104   :  { %v311_v54 = vpop.f32.mrf.mxu3 }
 0x105   :  { %v270_v61 = vadd.f32 %v269_v49, %v214_v56 }
 0x107   :  { %v312_v63 = vadd.f32 %v311_v54, %v270_v61 }
 0x109   :  { %v423_v6 = vpop.f32.mrf.mxu1 }
 0x10a   :  { %v113_v57 = vpop.f32.mrf.mxu0  ;;  %v273_v58 = vpop.f32.mrf.mxu2 }
 0x10b   :  { %v217_v59 = vadd.f32 %v216_v55, %v113_v57 }
 0x10c   :  { %v316_v60 = vpop.f32.mrf.mxu3 }
 0x10d   :  { %v274_v62 = vadd.f32 %v273_v58, %v217_v59 }
 0x10f   :  { %v317_v0 = vadd.f32 %v316_v60, %v274_v62 }
 0x112   :  { %v384_v1 = vpop.f32.mrf.mxu0  ;;  %v387_v2 = vpop.f32.mrf.mxu2 }
 0x113   :  { %v385_v4 = vadd.f32 %v384_v1, %v312_v63  ;;  %v388_v5 = vadd.f32 %v387_v2, %v317_v0 }
 0x114   :  { %v426_v10 = vpop.f32.mrf.mxu3 }
 0x115   :  { %v424_v11 = vadd.f32 %v423_v6, %v385_v4  ;;  %v427_v12 = vadd.f32 %v426_v10, %v388_v5 }
 0x117   :  { %v438_v13 = vmul.f32 5.656854, %v424_v11  ;;  %v439_v17 = vmul.f32 5.656854, %v427_v12 }
 0x119   :  { %440 = vst [vmem:[#allocation6] sm:$0xff] %v438_v13 }
 0x11a   :  { %441 = vst [vmem:[#allocation6 + $0x8] sm:$0xff] %v439_v17 }
 0x11b   :  { %454 = dma.vmem_to_hbm [thread:$0]  %s447_s19, 256, %s449_s22, [#allocation5], %s560_s14, %s560_s14, %s561_s15  }
 0x11c   :  { %557 = dma.done.wait [#allocation5], 256  }
 0x11d   :  { %558 = vsyncadd [#allocation5], 4294967040 }
 0x11e   :  { %459 = vsyncpa [#allocation4], 1 }
 0x11f   :  { %460 = vsyncpa [#allocation5], 1 }

</bundles_post_ra>
